<compile_context>
chip_gen: v7x
topology: tpu7x:2x2x1
jax: 0.10.0
libtpu: 0.0.40
codegen_flags: <defaults>
</compile_context>

<pallas_src>
import functools

import jax
import jax.numpy as jnp
from jax import lax
from jax.experimental import pallas as pl
from jax.experimental.pallas import tpu as pltpu


DEFAULT_TILE_B = 1024  # multiple of 8 / 128 / 256 -> MXU + sublane friendly on v5e/v6e/v7x


def _round_up(x, m):
    return ((x + m - 1) // m) * m


# ----------------------------- Pallas kernel --------------------------------


def _fused_mlp_kernel(n_emb, cat_offsets, total_cards, *refs):
    """One batch tile: fused (one-hot) embedding gather + 3-layer MLP (eval mode).

    ref order (n_emb > 0): x_num, x_cat, w1_emb_fused, w1_num, b1, w2, b2, w3_row, b3, out
    ref order (n_emb == 0): x_num, w1_num, b1, w2, b2, w3_row, b3, out
    """
    if n_emb > 0:
        (x_num_ref, x_cat_ref, w1e_ref, w1n_ref,
         b1_ref, w2_ref, b2_ref, w3_ref, b3_ref, o_ref) = refs
    else:
        (x_num_ref, w1n_ref,
         b1_ref, w2_ref, b2_ref, w3_ref, b3_ref, o_ref) = refs

    xb = x_num_ref[...]                          # bf16 [TB, num_numeric]
    tb = xb.shape[0]

    # ---- Layer 1: numeric feature block (MXU) ----
    h1 = jnp.dot(xb, w1n_ref[...], preferred_element_type=jnp.float32)

    # ---- Layer 1: embedding block — combined one-hot @ (table @ W1) (MXU) ----
    if n_emb > 0:
        idx = x_cat_ref[...]                     # int32 [TB, n_emb]
        iota = lax.broadcasted_iota(jnp.int32, (tb, total_cards), 1)
        hit = (idx[:, 0:1] + cat_offsets[0]) == iota
        for j in range(1, n_emb):
            hit = jnp.logical_or(hit, (idx[:, j:j + 1] + cat_offsets[j]) == iota)
        onehot = jnp.where(hit, 1.0, 0.0).astype(jnp.bfloat16)
        # exactly one hit per feature block -> exact row gather of (table @ W1_block)
        h1 = h1 + jnp.dot(onehot, w1e_ref[...],
                          preferred_element_type=jnp.float32)

    # bias + ReLU in f32 (Dropout = eval-mode identity)
    h1 = jnp.maximum(h1 + b1_ref[...], 0.0)

    # ---- Layer 2 (MXU) ----
    h2 = jnp.dot(h1.astype(jnp.bfloat16), w2_ref[...],
                 preferred_element_type=jnp.float32) + b2_ref[...]
    h2 = jnp.maximum(h2, 0.0)

    # ---- Layer 3: N=1 -> VPU multiply + lane reduction instead of MXU pass ----
    out = jnp.sum(h2 * w3_ref[...], axis=-1, keepdims=True) + b3_ref[...]
    o_ref[...] = out.astype(o_ref.dtype)


# --------------------------- parameter preparation ---------------------------


def xavier_uniform(key, fan_in, fan_out, dtype=jnp.float32):
    bound = (6.0 / (fan_in + fan_out)) ** 0.5
    # stored as [in, out] so the forward computes x @ W
    return jax.random.uniform(key, (fan_in, fan_out), dtype, minval=-bound, maxval=bound)


def init_params(key, cat_cardinalities, embedding_dims, num_numeric, hidden_dims):
    total_emb = sum(embedding_dims)
    input_dim = total_emb + num_numeric
    keys = jax.random.split(key, len(cat_cardinalities) + len(hidden_dims) + 1)

    # nn.Embedding default init: N(0, 1)
    emb_tables = [
        jax.random.normal(keys[i], (card, dim), jnp.float32)
        for i, (card, dim) in enumerate(zip(cat_cardinalities, embedding_dims))
    ]

    dims = [input_dim] + list(hidden_dims) + [1]
    linear = []
    for li, (d_in, d_out) in enumerate(zip(dims[:-1], dims[1:])):
        w = xavier_uniform(keys[len(cat_cardinalities) + li], d_in, d_out)
        b = jnp.zeros((d_out,), jnp.float32)          # nn.init.zeros_
        linear.append((w, b))
    return emb_tables, linear


def prepare_kernel_params(emb_tables, linear_params, embedding_dims, num_numeric):
    """One-time repack: fold embedding tables into W1, cast MXU operands to bf16."""
    (w1, b1), (w2, b2), (w3, b3) = linear_params
    w1 = w1.astype(jnp.float32)
    w1_num = w1[:num_numeric].astype(jnp.bfloat16)

    offsets, acc = [], 0
    fused_blocks = []
    off = num_numeric
    for t, d in zip(emb_tables, embedding_dims):
        offsets.append(acc)
        acc += int(t.shape[0])
        # (card_j, emb_dim) @ (emb_dim, H1) -> (card_j, H1), done once in f32
        fused_blocks.append(jnp.dot(t.astype(jnp.float32), w1[off:off + d]))
        off += d
    w1_emb_fused = (jnp.concatenate(fused_blocks, axis=0).astype(jnp.bfloat16)
                    if fused_blocks else None)

    return dict(
        n_emb=len(emb_tables),
        cat_offsets=tuple(offsets),
        total_cards=int(acc),
        w1_emb_fused=w1_emb_fused,                       # (total_cards, H1) bf16
        w1_num=w1_num,                                   # (num_numeric, H1) bf16
        b1=b1.reshape(1, -1).astype(jnp.float32),
        w2=w2.astype(jnp.bfloat16),
        b2=b2.reshape(1, -1).astype(jnp.float32),
        w3_row=w3.reshape(1, -1).astype(jnp.float32),    # (1, H2) for VPU reduce
        b3=b3.reshape(1, 1).astype(jnp.float32),
    )


# ------------------------------- full forward --------------------------------


def baseline_embedding_nn_forward(x_num, x_cat, kparams, *,
                                  tile_b=DEFAULT_TILE_B,
                                  vmem_limit_bytes=32 * 1024 * 1024):
    """Equivalent of BaselineEmbeddingNN.forward (eval mode), fused in one kernel."""
    B, num_numeric = x_num.shape
    n_emb = kparams["n_emb"] if x_cat is not None else 0

    tile_b = min(tile_b, _round_up(B, 8))   # no giant padding for small batches
    pad_b = _round_up(B, tile_b)
    grid = (pad_b // tile_b,)

    def resident(arr):
        nd = arr.ndim
        return pl.BlockSpec(arr.shape, lambda i, _nd=nd: (0,) * _nd)

    inputs = [jnp.pad(x_num.astype(jnp.bfloat16), ((0, pad_b - B), (0, 0)))]
    in_specs = [pl.BlockSpec((tile_b, num_numeric), lambda i: (i, 0))]

    if n_emb > 0:
        n_cat = x_cat.shape[1]
        inputs.append(jnp.pad(x_cat.astype(jnp.int32), ((0, pad_b - B), (0, 0))))
        in_specs.append(pl.BlockSpec((tile_b, n_cat), lambda i: (i, 0)))
        inputs.append(kparams["w1_emb_fused"])
        in_specs.append(resident(kparams["w1_emb_fused"]))

    for name in ("w1_num", "b1", "w2", "b2", "w3_row", "b3"):
        inputs.append(kparams[name])
        in_specs.append(resident(kparams[name]))

    kernel = functools.partial(
        _fused_mlp_kernel, n_emb, kparams["cat_offsets"], kparams["total_cards"])

    out = pl.pallas_call(
        kernel,
        out_shape=jax.ShapeDtypeStruct((pad_b, 1), jnp.float32),
        grid=grid,
        in_specs=in_specs,
        out_specs=pl.BlockSpec((tile_b, 1), lambda i: (i, 0)),
        compiler_params=pltpu.CompilerParams(
            dimension_semantics=("parallel",),
            vmem_limit_bytes=vmem_limit_bytes,
        ),
    )(*inputs)
    return out[:B]


# ----------------------------------- demo ------------------------------------


if __name__ == "__main__":
    # Small synthetic configuration consistent with the module's __init__.
    cat_cardinalities = [10, 20, 7]
    embedding_dims = [4, 8, 4]       # total_emb_dim = 16
    num_numeric = 6                  # input_dim = 22
    hidden_dims = [64, 32]
    batch = 8

    key = jax.random.PRNGKey(0)
    kp, kn, kc = jax.random.split(key, 3)

    emb_tables, linear_params = init_params(
        kp, cat_cardinalities, embedding_dims, num_numeric, hidden_dims)
    kparams = prepare_kernel_params(
        emb_tables, linear_params, embedding_dims, num_numeric)

    x_num = jax.random.normal(kn, (batch, num_numeric), jnp.float32)
    x_cat = jnp.stack(
        [
            jax.random.randint(jax.random.fold_in(kc, i), (batch,), 0, card)
            for i, card in enumerate(cat_cardinalities)
        ],
        axis=1,
    )  # [batch, num_cat] int32

    out = baseline_embedding_nn_forward(x_num, x_cat, kparams)
    out = jax.block_until_ready(out)

    # Pure-JAX f32 reference matching the PyTorch forward (eval mode).
    (w1, b1), (w2, b2), (w3, b3) = linear_params
    embs = [jnp.take(t, x_cat[:, j], axis=0) for j, t in enumerate(emb_tables)]
    x_full = jnp.concatenate([x_num] + embs, axis=1)
    h1 = jnp.maximum(x_full @ w1 + b1.reshape(1, -1), 0.0)
    h2 = jnp.maximum(h1 @ w2 + b2.reshape(1, -1), 0.0)
    ref = h2 @ w3 + b3.reshape(1, -1)

    assert out.shape == (batch, 1)
    max_err = float(jnp.max(jnp.abs(out - ref)))
    assert jnp.allclose(out, ref, atol=3e-2, rtol=3e-2), f"max abs diff {max_err}"
    print("KERNEL_OK")
</pallas_src>

<mosaic_0001>
module attributes {stable_mosaic.version = 11 : i64} {
  func.func @_fused_mlp_kernel(%arg0: i32, %arg1: memref<8x6xbf16, #tpu.memory_space<vmem>>, %arg2: memref<8x3xi32, #tpu.memory_space<vmem>>, %arg3: memref<37x64xbf16, #tpu.memory_space<vmem>>, %arg4: memref<6x64xbf16, #tpu.memory_space<vmem>>, %arg5: memref<1x64xf32, #tpu.memory_space<vmem>>, %arg6: memref<64x32xbf16, #tpu.memory_space<vmem>>, %arg7: memref<1x32xf32, #tpu.memory_space<vmem>>, %arg8: memref<1x32xf32, #tpu.memory_space<vmem>>, %arg9: memref<1x1xf32, #tpu.memory_space<vmem>>, %arg10: memref<8x1xf32, #tpu.memory_space<vmem>>) attributes {dimension_semantics = [#tpu.dimension_semantics<parallel>], iteration_bounds = array<i64: 1>, scalar_prefetch = 0 : i64, scratch_operands = 0 : i64, tpu.core_type = #tpu.core_type<tc>, window_params = [{transform_indices = @transform_0, window_bounds = array<i64: 8, 6>}, {transform_indices = @transform_1, window_bounds = array<i64: 8, 3>}, {pipeline_mode = #tpu.pipeline_mode<synchronous>, transform_indices = @transform_2, window_bounds = array<i64: 37, 64>}, {pipeline_mode = #tpu.pipeline_mode<synchronous>, transform_indices = @transform_3, window_bounds = array<i64: 6, 64>}, {pipeline_mode = #tpu.pipeline_mode<synchronous>, transform_indices = @transform_4, window_bounds = array<i64: 1, 64>}, {pipeline_mode = #tpu.pipeline_mode<synchronous>, transform_indices = @transform_5, window_bounds = array<i64: 64, 32>}, {pipeline_mode = #tpu.pipeline_mode<synchronous>, transform_indices = @transform_6, window_bounds = array<i64: 1, 32>}, {pipeline_mode = #tpu.pipeline_mode<synchronous>, transform_indices = @transform_7, window_bounds = array<i64: 1, 32>}, {pipeline_mode = #tpu.pipeline_mode<synchronous>, transform_indices = @transform_8, window_bounds = array<i64: 1, 1>}, {transform_indices = @transform_9, window_bounds = array<i64: 8, 1>}]} {
    %c0 = arith.constant 0 : index
    %c0_0 = arith.constant 0 : index
    %0 = vector.load %arg1[%c0, %c0_0] : memref<8x6xbf16, #tpu.memory_space<vmem>>, vector<8x6xbf16>
    %c0_1 = arith.constant 0 : index
    %c0_2 = arith.constant 0 : index
    %1 = vector.load %arg4[%c0_1, %c0_2] : memref<6x64xbf16, #tpu.memory_space<vmem>>, vector<6x64xbf16>
    %cst = arith.constant dense<0.000000e+00> : vector<8x64xf32>
    %2 = tpu.matmul %0, %1, %cst {dimension_numbers = #tpu.dot_dimension_numbers<[1], [0], [0], [1], [0, 0, 1, 1], [], []>} : vector<8x6xbf16>, vector<6x64xbf16>, vector<8x64xf32> -> vector<8x64xf32>
    %c0_3 = arith.constant 0 : index
    %c0_4 = arith.constant 0 : index
    %3 = vector.load %arg2[%c0_3, %c0_4] : memref<8x3xi32, #tpu.memory_space<vmem>>, vector<8x3xi32>
    %4 = tpu.iota {dimensions = array<i32: 1>} : vector<8x37xi32>
    %5 = vector.extract_strided_slice %3 {offsets = [0, 0], sizes = [8, 1], strides = [1, 1]} : vector<8x3xi32> to vector<8x1xi32>
    %c0_i32 = arith.constant 0 : i32
    %6 = vector.broadcast %c0_i32 : i32 to vector<8x1xi32>
    %7 = arith.addi %5, %6 : vector<8x1xi32>
    %8 = vector.broadcast %7 : vector<8x1xi32> to vector<8x37xi32>
    %9 = arith.cmpi eq, %8, %4 : vector<8x37xi32>
    %10 = vector.extract_strided_slice %3 {offsets = [0, 1], sizes = [8, 1], strides = [1, 1]} : vector<8x3xi32> to vector<8x1xi32>
    %c10_i32 = arith.constant 10 : i32
    %11 = vector.broadcast %c10_i32 : i32 to vector<8x1xi32>
    %12 = arith.addi %10, %11 : vector<8x1xi32>
    %13 = vector.broadcast %12 : vector<8x1xi32> to vector<8x37xi32>
    %14 = arith.cmpi eq, %13, %4 : vector<8x37xi32>
    %15 = arith.ori %9, %14 : vector<8x37xi1>
    %16 = vector.extract_strided_slice %3 {offsets = [0, 2], sizes = [8, 1], strides = [1, 1]} : vector<8x3xi32> to vector<8x1xi32>
    %c30_i32 = arith.constant 30 : i32
    %17 = vector.broadcast %c30_i32 : i32 to vector<8x1xi32>
    %18 = arith.addi %16, %17 : vector<8x1xi32>
    %19 = vector.broadcast %18 : vector<8x1xi32> to vector<8x37xi32>
    %20 = arith.cmpi eq, %19, %4 : vector<8x37xi32>
    %21 = arith.ori %15, %20 : vector<8x37xi1>
    %cst_5 = arith.constant 1.000000e+00 : f32
    %cst_6 = arith.constant 0.000000e+00 : f32
    %22 = vector.broadcast %cst_5 : f32 to vector<8x37xf32>
    %23 = vector.broadcast %cst_6 : f32 to vector<8x37xf32>
    %24 = arith.select %21, %22, %23 : vector<8x37xi1>, vector<8x37xf32>
    %25 = arith.truncf %24 : vector<8x37xf32> to vector<8x37xbf16>
    %c0_7 = arith.constant 0 : index
    %c0_8 = arith.constant 0 : index
    %26 = vector.load %arg3[%c0_7, %c0_8] : memref<37x64xbf16, #tpu.memory_space<vmem>>, vector<37x64xbf16>
    %cst_9 = arith.constant dense<0.000000e+00> : vector<8x64xf32>
    %27 = tpu.matmul %25, %26, %cst_9 {dimension_numbers = #tpu.dot_dimension_numbers<[1], [0], [0], [1], [0, 0, 1, 1], [], []>} : vector<8x37xbf16>, vector<37x64xbf16>, vector<8x64xf32> -> vector<8x64xf32>
    %28 = arith.addf %2, %27 : vector<8x64xf32>
    %c0_10 = arith.constant 0 : index
    %c0_11 = arith.constant 0 : index
    %29 = vector.load %arg5[%c0_10, %c0_11] : memref<1x64xf32, #tpu.memory_space<vmem>>, vector<1x64xf32>
    %30 = vector.broadcast %29 : vector<1x64xf32> to vector<8x64xf32>
    %31 = arith.addf %28, %30 : vector<8x64xf32>
    %cst_12 = arith.constant 0.000000e+00 : f32
    %32 = vector.broadcast %cst_12 : f32 to vector<8x64xf32>
    %33 = arith.maximumf %31, %32 : vector<8x64xf32>
    %34 = arith.truncf %33 : vector<8x64xf32> to vector<8x64xbf16>
    %c0_13 = arith.constant 0 : index
    %c0_14 = arith.constant 0 : index
    %35 = vector.load %arg6[%c0_13, %c0_14] : memref<64x32xbf16, #tpu.memory_space<vmem>>, vector<64x32xbf16>
    %cst_15 = arith.constant dense<0.000000e+00> : vector<8x32xf32>
    %36 = tpu.matmul %34, %35, %cst_15 {dimension_numbers = #tpu.dot_dimension_numbers<[1], [0], [0], [1], [0, 0, 1, 1], [], []>} : vector<8x64xbf16>, vector<64x32xbf16>, vector<8x32xf32> -> vector<8x32xf32>
    %c0_16 = arith.constant 0 : index
    %c0_17 = arith.constant 0 : index
    %37 = vector.load %arg7[%c0_16, %c0_17] : memref<1x32xf32, #tpu.memory_space<vmem>>, vector<1x32xf32>
    %38 = vector.broadcast %37 : vector<1x32xf32> to vector<8x32xf32>
    %39 = arith.addf %36, %38 : vector<8x32xf32>
    %cst_18 = arith.constant 0.000000e+00 : f32
    %40 = vector.broadcast %cst_18 : f32 to vector<8x32xf32>
    %41 = arith.maximumf %39, %40 : vector<8x32xf32>
    %c0_19 = arith.constant 0 : index
    %c0_20 = arith.constant 0 : index
    %42 = vector.load %arg8[%c0_19, %c0_20] : memref<1x32xf32, #tpu.memory_space<vmem>>, vector<1x32xf32>
    %43 = vector.broadcast %42 : vector<1x32xf32> to vector<8x32xf32>
    %44 = arith.mulf %41, %43 : vector<8x32xf32>
    %cst_21 = arith.constant dense<0.000000e+00> : vector<8xf32>
    %45 = vector.multi_reduction <add>, %44, %cst_21 [1] : vector<8x32xf32> to vector<8xf32>
    %46 = vector.shape_cast %45 : vector<8xf32> to vector<8x1xf32>
    %c0_22 = arith.constant 0 : index
    %c0_23 = arith.constant 0 : index
    %47 = vector.load %arg9[%c0_22, %c0_23] : memref<1x1xf32, #tpu.memory_space<vmem>>, vector<1x1xf32>
    %48 = vector.broadcast %47 : vector<1x1xf32> to vector<8x1xf32>
    %49 = arith.addf %46, %48 : vector<8x1xf32>
    %c0_24 = arith.constant 0 : index
    %c0_25 = arith.constant 0 : index
    %50 = vector.load %arg10[%c0_24, %c0_25] : memref<8x1xf32, #tpu.memory_space<vmem>>, vector<8x1xf32>
    tpu.vector_store %arg10[%c0_24, %c0_25], %49 {strides = array<i32>} : memref<8x1xf32, #tpu.memory_space<vmem>>, vector<8x1xf32>,
    return
  }
  func.func @transform_0(%arg0: i32) -> (i32, i32) {
    %c0_i32 = arith.constant 0 : i32
    %c0_i32_0 = arith.constant 0 : i32
    return %arg0, %c0_i32 : i32, i32
  }
  func.func @transform_1(%arg0: i32) -> (i32, i32) {
    %c0_i32 = arith.constant 0 : i32
    %c0_i32_0 = arith.constant 0 : i32
    return %arg0, %c0_i32 : i32, i32
  }
  func.func @transform_2(%arg0: i32) -> (i32, i32) {
    %c0_i32 = arith.constant 0 : i32
    %c0_i32_0 = arith.constant 0 : i32
    %c0_i32_1 = arith.constant 0 : i32
    return %c0_i32, %c0_i32_0 : i32, i32
  }
  func.func @transform_3(%arg0: i32) -> (i32, i32) {
    %c0_i32 = arith.constant 0 : i32
    %c0_i32_0 = arith.constant 0 : i32
    %c0_i32_1 = arith.constant 0 : i32
    return %c0_i32, %c0_i32_0 : i32, i32
  }
  func.func @transform_4(%arg0: i32) -> (i32, i32) {
    %c0_i32 = arith.constant 0 : i32
    %c0_i32_0 = arith.constant 0 : i32
    %c0_i32_1 = arith.constant 0 : i32
    return %c0_i32, %c0_i32_0 : i32, i32
  }
  func.func @transform_5(%arg0: i32) -> (i32, i32) {
    %c0_i32 = arith.constant 0 : i32
    %c0_i32_0 = arith.constant 0 : i32
    %c0_i32_1 = arith.constant 0 : i32
    return %c0_i32, %c0_i32_0 : i32, i32
  }
  func.func @transform_6(%arg0: i32) -> (i32, i32) {
    %c0_i32 = arith.constant 0 : i32
    %c0_i32_0 = arith.constant 0 : i32
    %c0_i32_1 = arith.constant 0 : i32
    return %c0_i32, %c0_i32_0 : i32, i32
  }
  func.func @transform_7(%arg0: i32) -> (i32, i32) {
    %c0_i32 = arith.constant 0 : i32
    %c0_i32_0 = arith.constant 0 : i32
    %c0_i32_1 = arith.constant 0 : i32
    return %c0_i32, %c0_i32_0 : i32, i32
  }
  func.func @transform_8(%arg0: i32) -> (i32, i32) {
    %c0_i32 = arith.constant 0 : i32
    %c0_i32_0 = arith.constant 0 : i32
    %c0_i32_1 = arith.constant 0 : i32
    return %c0_i32, %c0_i32_0 : i32, i32
  }
  func.func @transform_9(%arg0: i32) -> (i32, i32) {
    %c0_i32 = arith.constant 0 : i32
    %c0_i32_0 = arith.constant 0 : i32
    return %arg0, %c0_i32 : i32, i32
  }
}

</mosaic_0001>

<bundles_post_ra>
// kernel: tpu_custom_call.1
= control target key start
LH: loop header
LB: loop body
LE: loop exit
PB: predicated region body
PF: predicated region fallthrough
CT: control target
= control target key end

     0   :  { %v366_v0 = vmov 0   ;;  %v367_v2 = vmov 2   ;;  %v368_v4 = vmov 0.0   ;;  %vm82_vm0 = vcmask 1041408   ;;  %s467_s1 = inlined_call_operand.vmem [shape: s32[8,3], index: 1, kind: input, shape index: {}]   ;;  %s468_s2 = inlined_call_operand.vmem [shape: bf16[37,64], index: 2, kind: input, shape index: {}]   ;;  %s469_s3 = inlined_call_operand.vmem [shape: bf16[6,64], index: 3, kind: input, shape index: {}]   ;;  %s470_s0 = inlined_call_operand.vmem [shape: bf16[8,6], index: 0, kind: input, shape index: {}]   ;;  %s471_s5 = inlined_call_operand.vmem [shape: bf16[64,32], index: 5, kind: input, shape index: {}]   ;;  %s472_s4 = inlined_call_operand.vmem [shape: f32[1,64], index: 4, kind: input, shape index: {}]   ;;  %s473_s8 = inlined_call_operand.<no memory space> [shape: f32[1,1], index: 8, kind: input, shape index: {}]   ;;  %s474_s6 = inlined_call_operand.vmem [shape: f32[1,32], index: 6, kind: input, shape index: {}]   ;;  %s475_s7 = inlined_call_operand.vmem [shape: f32[1,32], index: 7, kind: input, shape index: {}]   ;;  %s476_s9 = inlined_call_operand.vmem [shape: f32[8,1], index: 9, kind: output, shape index: {}]  }
   0x1   :  { %355 = vset.pattern.permute.xlu0 %v366_v0  ;;  %v37_v1 = vld [vmem:[%s467_s1] sm:$0xff]  ;;  %357 = vset.pattern.permute.xlu1 %v367_v2  ;;  %v360_v7 = vld [vmem:[%s468_s2 + $0x8] sm:$0xff]   ;;  %vm83_vm1 = vcmask 1042432   ;;  %v369_v9 = vmov 1   ;;  %v370_v11 = vmov 65535   ;;  %vm371_vm2 = vmmov 0  }
   0x2   :  { %41 = vperm.xlu0 %355, %v37_v1   ;;  %v50_v3 = vadd.s32 30, %v37_v1  ;;  %321 = vmatprep.subr.bf16.mxu0 %v368_v4  ;;  %v359_v5 = vld [vmem:[%s468_s2] sm:$0xff]   ;;  %v44_v6 = vadd.s32 10, %v37_v1  ;;  %v361_v10 = vld [vmem:[%s468_s2 + $0x10] ss:$0 sps:$4 sm:$0x77]   ;;  %v38_v19 = vlaneseq  ;;  %v14_v41 = vstv %s473_s8 }
   0x3   :  { %331 = vmatprep.subr.bf16.mxu1 %v368_v4  ;;  %322 = vmatpush3.bf16.msra.mxu0 %v359_v5  ;;  %v36_v8 = vld [vmem:[%s469_s3] sm:$0x7]  ;;  %v84_v12 = vsel %vm82_vm0, 4294967295, %v370_v11  ;;  %vm129_vm3 = vcmask 48128   ;;  %v363_v18 = vld [vmem:[%s471_s5 + $0x8] sm:$0xff]   ;;  %vm78_vm9 = vcmask 302080  }
   0x4   :  { %52 = vperm.xlu1 %357, %v50_v3   ;;  %323 = vmatprep.subr.bf16.mxu0 %v368_v4  ;;  %v134_v13 = vsel %vm83_vm1, %v36_v8, 0  ;;  %v85_v14 = vsel %vm83_vm1, %v84_v12, 0  ;;  %v35_v16 = vld [vmem:[%s470_s0] sm:$0xf]  ;;  %v39_v21 = vand.u32 127, %v38_v19  ;;  %v364_v30 = vld [vmem:[%s471_s5 + $0x10] sm:$0xff]  }
   0x5   :  { %332 = vmatpush3.bf16.msra.mxu1 %v134_v13  ;;  %v87_v15 = vand.u32 %v361_v10, %v85_v14  ;;  %333 = vmatprep.mubr.msk.bf16.mxu1 %vm371_vm2, %v368_v4  ;;  %v362_v17 = vld [vmem:[%s471_s5] sm:$0xff]   ;;  %v365_v31 = vld [vmem:[%s471_s5 + $0x18] sm:$0xff]   ;;  %vm225_vm10 = vcmask 523264   ;;  %15 = vst [vmem:[#allocation2] sm:$0x1] %v14_v41  ;;  %vm278_vm11 = vcmask 261120  }
   0x6   :  { %356 = vset.pattern.permute.xlu0 %v369_v9  ;;  %337 = vmatprep.subr.bf16.mxu1 %v368_v4  ;;  %v301_v33 = vld [vmem:[%s472_s4] ss:$0 sm:$0xff]  ;;  %vm290_vm12 = vcmask 7168  }
   0x7   :  { %46 = vperm.xlu0 %356, %v44_v6   ;;  %324 = vmatpush3.bf16.msra.mxu0 %v360_v7  ;;  %v302_v42 = vld [vmem:[%s474_s6] ss:$0 sm:$0xff] }
   0x8   :  { %325 = vmatprep.subr.bf16.mxu0 %v368_v4  ;;  %334 = vmatmul.mubr.msk.bf16.vlgmr.msra.gmra.mrb[0].mxu1 %vm129_vm3, %v35_v16  ;;  %v308_v47 = vld [vmem:[%s475_s7] ss:$0 sm:$0xff] }
   0x9   :  { %327 = vmatprep.mubr.msk.bf16.mxu0 %vm371_vm2, %v368_v4  ;;  %345 = vmatprep.mubr.msk.bf16.mxu1 %vm371_vm2, %v368_v4 }
   0xa   :  { %338 = vmatpush3.bf16.msra.mxu1 %v362_v17 }
   0xb   :  { %358 = vset.pattern.permute.xlu0 %v367_v2  ;;  %326 = vmatpush3.bf16.msra.mxu0 %v87_v15 }
   0xc   :  { %339 = vmatprep.subr.bf16.mxu1 %v368_v4  ;;  %v309_v52 = vld [vmem:[#allocation2] ss:$0 sm:$0xff] }
   0xe   :  { %340 = vmatpush3.bf16.msra.mxu1 %v363_v18 }
   0xf   :  { %341 = vmatprep.subr.bf16.mxu1 %v368_v4 }
  0x12   :  { %342 = vmatpush3.bf16.msra.mxu1 %v364_v30 }
  0x13   :  { %343 = vmatprep.subr.bf16.mxu1 %v368_v4 }
  0x16   :  { %344 = vmatpush3.bf16.msra.mxu1 %v365_v31 }
  0x81   :  { %v42_v20 = vpop.permute.xlu0 %41 }
  0x82   :  { %vm43_vm5 = vcmp.eq.s32.totalorder %v42_v20, %v39_v21 }
  0x83   :  { %v53_v22 = vpop.permute.xlu1 %52 }
  0x84   :  { %vm54_vm4 = vcmp.eq.s32.totalorder %v53_v22, %v39_v21 }
  0x86   :  { %v47_v23 = vpop.permute.xlu0 %46 }
  0x87   :  { %vm48_vm6 = vcmp.eq.s32.totalorder %v47_v23, %v39_v21 }
  0x88   :  { %vm49_vm7 = vmor %vm43_vm5, %vm48_vm6 }
  0x89   :  { %vm55_vm8 = vmor %vm49_vm7, %vm54_vm4 }
  0x8a   :  { %v56_v24 = vsel %vm55_vm8, 1.0, %v368_v4 }
  0x8b   :  { %v57_v25 = vpack.c.bf16 %v56_v24, %v56_v24 }
  0x8d   :  { %328 = vmatmul.mubr.msk.bf16.vlgmr.msra.gmra.mrb[0].mxu0 %vm78_vm9, %v57_v25 }
  0xdb   :  { %v170_v26 = vpop.f32.mrb[0].mxu1 }
  0xdc   :  { %v335_v27 = vpop.f32.mrb[1].mxu1 }
  0xdd   :  { %v173_v28 = vpop.f32.mrb[2].mxu1 }
  0xde   :  { %v336_v29 = vpop.f32.mrb[3].mxu1 }
 0x160   :  { %v123_v32 = vpop.f32.mrb[0].mxu0 }
 0x161   :  { %v171_v34 = vadd.f32 %v170_v26, %v123_v32  ;;  %v329_v35 = vpop.f32.mrb[1].mxu0 }
 0x162   :  { %v126_v36 = vpop.f32.mrb[2].mxu0 }
 0x163   :  { %v183_v37 = vadd.f32 %v301_v33, %v171_v34  ;;  %v330_v38 = vpop.f32.mrb[3].mxu0 }
 0x165   :  { %v184_v39 = vmax.f32 %v183_v37, 0.0 }
 0x167   :  { %v185_v40 = vpack.c.bf16 %v184_v39, %v184_v39 }
 0x169   :  { %346 = vmatmul.mubr.msk.bf16.vlgmr.msra.gmra.mrb[4].mxu1 %vm225_vm10, %v185_v40 }
 0x23c   :  { %v263_v43 = vpop.f32.mrb[4].mxu1 }
 0x23d   :  { %v264_v44 = vadd.f32 %v302_v42, %v263_v43  ;;  %v347_v45 = vpop.f32.mrb[5].mxu1 }
 0x23e   :  { %v266_v46 = vpop.f32.mrb[6].mxu1 }
 0x23f   :  { %v269_v48 = vmax.f32 %v264_v44, 0.0  ;;  %v348_v49 = vpop.f32.mrb[7].mxu1 }
 0x241   :  { %v277_v50 = vmul.f32 %v308_v47, %v269_v48 }
 0x243   :  { %v279_v51 = vsel %vm278_vm11, %v277_v50, 0.0 }
 0x244   :  { %280 = vadd.xlane.f32.xlu1 %v279_v51 }
 0x2d1   :  { %v281_v53 = vpop.xlane.xlu1 %280 }
 0x2d2   :  { %v289_v54 = vadd.f32 %v309_v52, %v281_v53 }
 0x2d4   :  { %291 = vst.msk [vmem:[%s476_s9] sm:$0xff] %vm290_vm12, %v289_v54 }

</bundles_post_ra>
